<compile_context>
chip_gen: v6e
topology: v6e:2x2x1
jax: 0.10.0
libtpu: 0.0.40
codegen_flags: <defaults>
</compile_context>

<pallas_src>
import math
import functools

import jax
import jax.numpy as jnp
from jax import lax
from jax.experimental import pallas as pl
from jax.experimental.pallas import tpu as pltpu


def _pick_group_size(num_heads, head_dim, target_lanes=256):
    """Largest divisor of num_heads with group_size * head_dim <= target_lanes."""
    g = max(1, min(num_heads, target_lanes // max(head_dim, 1)))
    while num_heads % g:
        g -= 1
    return g


def _make_kernel(*, return_probs, G, d, num_groups, ln_eps, compute_dtype,
                 grouped_ctx_scratch):
    Gd = G * d

    def body(hs_ref, mask_ref, wq_ref, bq_ref, wk_ref, bk_ref, wv_ref, bv_ref,
             wo_ref, bo_ref, gamma_ref, beta_ref, out_ref, probs_ref,
             x_scratch, ctx_scratch):
        g = pl.program_id(1)
        S = hs_ref.shape[1]
        cd = compute_dtype

        # Hoisted activation cast: the hidden block is resident across the
        # head-group axis; cast it once per batch element.
        @pl.when(g == 0)
        def _():
            x_scratch[...] = hs_ref[0].astype(cd)

        x_c = x_scratch[...]                       # (S, H) compute dtype
        mask_row = mask_ref[0, 0]                  # (1, S) f32, broadcast over queries

        # Fused G-head projections: (S, H) x (H, G*d), f32 accumulation.
        # 1/sqrt(d) is already folded into Wq / bq on the host.
        q = jnp.dot(x_c, wq_ref[0], preferred_element_type=jnp.float32) + bq_ref[0]
        k = jnp.dot(x_c, wk_ref[0], preferred_element_type=jnp.float32) + bk_ref[0]
        v = jnp.dot(x_c, wv_ref[0], preferred_element_type=jnp.float32) + bv_ref[0]

        q3 = q.astype(cd).reshape(S, G, d)
        k3 = k.astype(cd).reshape(S, G, d)
        v3 = v.astype(cd).reshape(S, G, d)

        # Per-head scores, batched over the G axis (f32 accumulation).
        scores = jnp.einsum('sgd,tgd->gst', q3, k3,
                            preferred_element_type=jnp.float32)     # (G, S, S)
        scores = scores + mask_row

        # Numerically stable softmax statistics in f32.
        m = jnp.max(scores, axis=-1, keepdims=True)
        e = jnp.exp(scores - m)
        denom = jnp.sum(e, axis=-1, keepdims=True)
        inv = pl.reciprocal(denom)                 # EUP; exact to hold 1e-5 tol

        if probs_ref is not None:
            probs_ref[0] = (e * inv).astype(probs_ref.dtype)

        # Context from the unnormalized exp(); normalize at (G,S,d) instead of
        # normalizing the whole (G,S,S) block before the matmul.
        ctx = jnp.einsum('gst,tgd->gsd', e.astype(cd), v3,
                         preferred_element_type=jnp.float32)         # (G, S, d)
        ctx = ctx * inv
        ctx_sgd = jnp.transpose(ctx, (1, 0, 2)).reshape(S, Gd).astype(cd)

        # Stash this group's context columns; the Wo projection is deferred to
        # a single full-width matmul on the last group.
        if num_groups == 1:
            ctx_scratch[...] = ctx_sgd
        elif not grouped_ctx_scratch:
            off = pl.multiple_of(g * Gd, 128)      # Gd % 128 == 0 on this path
            ctx_scratch[:, pl.ds(off, Gd)] = ctx_sgd
        else:
            ctx_scratch[g] = ctx_sgd

        @pl.when(g == num_groups - 1)
        def _():
            if num_groups == 1 or not grouped_ctx_scratch:
                ctx_full = ctx_scratch[...]                          # (S, H)
            else:
                ctx_full = jnp.transpose(ctx_scratch[...], (1, 0, 2)).reshape(
                    S, num_groups * Gd)
            # Single (S,H)x(H,H) output projection.
            attn = jnp.dot(ctx_full, wo_ref[...],
                           preferred_element_type=jnp.float32) + bo_ref[...]
            # TODO(synk): training-mode dropout (identity in eval mode).
            y = attn + hs_ref[0].astype(jnp.float32)
            mu = jnp.mean(y, axis=-1, keepdims=True)
            var = jnp.mean((y - mu) * (y - mu), axis=-1, keepdims=True)
            y_n = (y - mu) * lax.rsqrt(var + ln_eps)
            out_ref[0] = (y_n * gamma_ref[...] + beta_ref[...]).astype(out_ref.dtype)

    if return_probs:
        def kernel(hs, msk, wq, bq, wk, bk, wv, bv, wo, bo, gm, bt,
                   out, probs, xs, cs):
            body(hs, msk, wq, bq, wk, bk, wv, bv, wo, bo, gm, bt,
                 out, probs, xs, cs)
    else:
        def kernel(hs, msk, wq, bq, wk, bk, wv, bv, wo, bo, gm, bt,
                   out, xs, cs):
            body(hs, msk, wq, bq, wk, bk, wv, bv, wo, bo, gm, bt,
                 out, None, xs, cs)
    return kernel


def _vmem_limit_bytes(S, H, Gd, G, act_bytes, w_bytes, probs_bytes, return_probs):
    """Generation-aware VMEM budget: pipelined blocks + in-kernel temporaries."""
    blocks = (S * H * act_bytes                     # hidden block
              + S * 4                               # mask row
              + 3 * (H * Gd * w_bytes + Gd * 4)     # Wq/Wk/Wv slabs + biases
              + H * H * w_bytes                     # Wo (full, resident)
              + 3 * H * 4                           # bo, gamma, beta
              + S * H * act_bytes)                  # out block
    if return_probs:
        blocks += G * S * S * probs_bytes           # probs block
    # Scratch + the large temporaries Mosaic materializes in scoped VMEM.
    temps = (2 * S * H * w_bytes                    # x cast + ctx scratch
             + 2 * G * S * S * 4                    # scores, exp (f32)
             + 4 * S * Gd * 4                       # q, k, v, ctx (f32)
             + 4 * S * Gd * w_bytes)                # compute-dtype copies
    total = 2 * blocks + temps + (8 << 20)          # 2x buffering + headroom
    try:
        cap = int(pltpu.get_tpu_info().vmem_capacity_bytes)
    except Exception:
        cap = 64 << 20                              # conservative fallback
    cap = int(cap * 0.85)                           # ~109 MiB v5e/v6e, ~54 MiB v7x
    return int(min(max(total, 16 << 20), cap))


def multi_head_attention(hidden_states, attention_mask, params, num_heads, *,
                         compute_dtype=jnp.float32, probs_dtype=jnp.float32,
                         return_probs=True, head_group_size=None):
    B, S, H = hidden_states.shape
    d = H // num_heads
    assert num_heads * d == H

    wq, bq, wk, bk, wv, bv, wo, bo, gamma, beta = params

    if attention_mask is None:
        attention_mask = jnp.zeros((B, 1, 1, S), jnp.float32)
    attention_mask = attention_mask.astype(jnp.float32)

    G = head_group_size if head_group_size is not None else _pick_group_size(num_heads, d)
    assert num_heads % G == 0
    n_groups = num_heads // G
    Gd = G * d
    scale = 1.0 / math.sqrt(d)

    # Host-side layout plumbing: head-group weight slabs; scale folded into Q.
    def group_w(w, s=1.0):                     # (H, H) -> (n_groups, H, G*d)
        return (w * s).reshape(H, n_groups, Gd).transpose(1, 0, 2).astype(compute_dtype)

    def group_b(b, s=1.0):                     # (1, H) -> (n_groups, 1, G*d)
        return (b * s).reshape(n_groups, 1, Gd).astype(jnp.float32)

    wq_g, bq_g = group_w(wq, scale), group_b(bq, scale)
    wk_g, bk_g = group_w(wk), group_b(bk)
    wv_g, bv_g = group_w(wv), group_b(bv)
    wo_c = wo.astype(compute_dtype)
    bo_f = bo.astype(jnp.float32)
    gamma_f = gamma.astype(jnp.float32)
    beta_f = beta.astype(jnp.float32)

    grouped_ctx = (n_groups > 1) and (Gd % 128 != 0)
    ctx_scratch_shape = (n_groups, S, Gd) if grouped_ctx else (S, H)

    kernel = _make_kernel(return_probs=return_probs, G=G, d=d,
                          num_groups=n_groups, ln_eps=1e-12,
                          compute_dtype=compute_dtype,
                          grouped_ctx_scratch=grouped_ctx)

    group_w_spec = lambda: pl.BlockSpec((1, H, Gd), lambda b, g: (g, 0, 0))
    group_b_spec = lambda: pl.BlockSpec((1, 1, Gd), lambda b, g: (g, 0, 0))
    row_spec = lambda: pl.BlockSpec((1, H), lambda b, g: (0, 0))

    in_specs = [
        pl.BlockSpec((1, S, H), lambda b, g: (b, 0, 0)),         # hidden_states
        pl.BlockSpec((1, 1, 1, S), lambda b, g: (b, 0, 0, 0)),   # attention_mask
        group_w_spec(), group_b_spec(),                          # Wq, bq
        group_w_spec(), group_b_spec(),                          # Wk, bk
        group_w_spec(), group_b_spec(),                          # Wv, bv
        pl.BlockSpec((H, H), lambda b, g: (0, 0)),               # Wo (full)
        row_spec(), row_spec(), row_spec(),                      # bo, gamma, beta
    ]

    out_spec_hidden = pl.BlockSpec((1, S, H), lambda b, g: (b, 0, 0))
    if return_probs:
        out_shape = (jax.ShapeDtypeStruct((B, S, H), hidden_states.dtype),
                     jax.ShapeDtypeStruct((B, num_heads, S, S), probs_dtype))
        out_specs = (out_spec_hidden,
                     pl.BlockSpec((1, G, S, S), lambda b, g: (b, g, 0, 0)))
    else:
        out_shape = jax.ShapeDtypeStruct((B, S, H), hidden_states.dtype)
        out_specs = out_spec_hidden

    act_bytes = jnp.dtype(hidden_states.dtype).itemsize
    w_bytes = jnp.dtype(compute_dtype).itemsize
    probs_bytes = jnp.dtype(probs_dtype).itemsize if return_probs else 0
    vmem_bytes = _vmem_limit_bytes(S, H, Gd, G, act_bytes, w_bytes,
                                   probs_bytes, return_probs)

    return pl.pallas_call(
        kernel,
        out_shape=out_shape,
        grid=(B, n_groups),
        in_specs=in_specs,
        out_specs=out_specs,
        scratch_shapes=[pltpu.VMEM((S, H), compute_dtype),            # x cast
                        pltpu.VMEM(ctx_scratch_shape, compute_dtype)],  # ctx
        compiler_params=pltpu.CompilerParams(
            dimension_semantics=("parallel", "arbitrary"),
            vmem_limit_bytes=vmem_bytes),
    )(hidden_states, attention_mask, wq_g, bq_g, wk_g, bk_g, wv_g, bv_g,
      wo_c, bo_f, gamma_f, beta_f)


def reference_mha(hidden_states, attention_mask, params, num_heads):
    """Pure-JAX reference matching the PyTorch forward (eval mode)."""
    wq, bq, wk, bk, wv, bv, wo, bo, gamma, beta = params
    B, S, H = hidden_states.shape
    d = H // num_heads

    def split(x):  # (B,S,H) -> (B,nH,S,d)
        return x.reshape(B, S, num_heads, d).transpose(0, 2, 1, 3)

    q = split(hidden_states @ wq + bq[0])
    k = split(hidden_states @ wk + bk[0])
    v = split(hidden_states @ wv + bv[0])

    scores = jnp.einsum('bhqd,bhkd->bhqk', q, k) / math.sqrt(d)
    scores = scores + attention_mask                  # (B,1,1,S) broadcast
    probs = jax.nn.softmax(scores, axis=-1)
    ctx = jnp.einsum('bhqk,bhkd->bhqd', probs, v)
    ctx = ctx.transpose(0, 2, 1, 3).reshape(B, S, H)
    attn_out = ctx @ wo + bo[0]
    y = attn_out + hidden_states
    mu = jnp.mean(y, axis=-1, keepdims=True)
    var = jnp.mean((y - mu) ** 2, axis=-1, keepdims=True)
    out = (y - mu) / jnp.sqrt(var + 1e-12) * gamma[0] + beta[0]
    return out, probs


if __name__ == "__main__":
    B, S, H, NH = 2, 8, 32, 4

    key = jax.random.PRNGKey(0)
    keys = jax.random.split(key, 9)

    def linear_params(kw, kb, fan_in, fan_out):
        bound = 1.0 / math.sqrt(fan_in)
        w = jax.random.uniform(kw, (fan_in, fan_out), jnp.float32, -bound, bound)
        b = jax.random.uniform(kb, (1, fan_out), jnp.float32, -bound, bound)
        return w, b

    wq, bq = linear_params(keys[0], keys[1], H, H)
    wk, bk = linear_params(keys[2], keys[3], H, H)
    wv, bv = linear_params(keys[4], keys[5], H, H)
    wo, bo = linear_params(keys[6], keys[7], H, H)
    gamma = jnp.ones((1, H), jnp.float32)
    beta = jnp.zeros((1, H), jnp.float32)
    params = (wq, bq, wk, bk, wv, bv, wo, bo, gamma, beta)

    hidden_states = jax.random.normal(keys[8], (B, S, H), jnp.float32)
    # mask: attend to all tokens except the last two of batch element 1
    mask = jnp.zeros((B, 1, 1, S), jnp.float32)
    mask = mask.at[1, 0, 0, -2:].set(-10000.0)

    ref_out, ref_probs = reference_mha(hidden_states, mask, params, NH)

    # f32 path with probs output: tight match against the reference.
    out, probs = multi_head_attention(hidden_states, mask, params, NH)
    out, probs = jax.block_until_ready((out, probs))
    assert jnp.allclose(out, ref_out, atol=1e-5, rtol=1e-5)
    assert jnp.allclose(probs, ref_probs, atol=1e-5, rtol=1e-5)

    # f32 path without the probs output (drops the dominant HBM writeback).
    out_np = multi_head_attention(hidden_states, mask, params, NH,
                                  return_probs=False)
    out_np = jax.block_until_ready(out_np)
    assert jnp.allclose(out_np, ref_out, atol=1e-5, rtol=1e-5)

    # bf16 MXU-operand path (f32 accumulation, f32 softmax/LayerNorm stats),
    # validated against the f32 reference with a loosened tolerance.
    out_bf, probs_bf = multi_head_attention(hidden_states, mask, params, NH,
                                            compute_dtype=jnp.bfloat16)
    out_bf, probs_bf = jax.block_until_ready((out_bf, probs_bf))
    assert jnp.allclose(out_bf, ref_out, atol=1.5e-1, rtol=1e-1)
    assert jnp.allclose(probs_bf, ref_probs, atol=5e-2, rtol=5e-2)

    print("KERNEL_OK")
</pallas_src>

<mosaic_0001>
module attributes {stable_mosaic.version = 11 : i64} {
  func.func @kernel(%arg0: i32, %arg1: i32, %arg2: memref<1x8x32xf32, #tpu.memory_space<vmem>>, %arg3: memref<1x1x1x8xf32, #tpu.memory_space<vmem>>, %arg4: memref<1x32x32xf32, #tpu.memory_space<vmem>>, %arg5: memref<1x1x32xf32, #tpu.memory_space<vmem>>, %arg6: memref<1x32x32xf32, #tpu.memory_space<vmem>>, %arg7: memref<1x1x32xf32, #tpu.memory_space<vmem>>, %arg8: memref<1x32x32xf32, #tpu.memory_space<vmem>>, %arg9: memref<1x1x32xf32, #tpu.memory_space<vmem>>, %arg10: memref<32x32xf32, #tpu.memory_space<vmem>>, %arg11: memref<1x32xf32, #tpu.memory_space<vmem>>, %arg12: memref<1x32xf32, #tpu.memory_space<vmem>>, %arg13: memref<1x32xf32, #tpu.memory_space<vmem>>, %arg14: memref<1x8x32xf32, #tpu.memory_space<vmem>>, %arg15: memref<1x4x8x8xf32, #tpu.memory_space<vmem>>, %arg16: memref<8x32xf32, #tpu.memory_space<vmem>>, %arg17: memref<8x32xf32, #tpu.memory_space<vmem>>) attributes {dimension_semantics = [#tpu.dimension_semantics<parallel>, #tpu.dimension_semantics<arbitrary>], iteration_bounds = array<i64: 2, 1>, scalar_prefetch = 0 : i64, scratch_operands = 2 : i64, tpu.core_type = #tpu.core_type<tc>, window_params = [{transform_indices = @transform_0, window_bounds = array<i64: 1, 8, 32>}, {transform_indices = @transform_1, window_bounds = array<i64: 1, 1, 1, 8>}, {transform_indices = @transform_2, window_bounds = array<i64: 1, 32, 32>}, {transform_indices = @transform_3, window_bounds = array<i64: 1, 1, 32>}, {transform_indices = @transform_4, window_bounds = array<i64: 1, 32, 32>}, {transform_indices = @transform_5, window_bounds = array<i64: 1, 1, 32>}, {transform_indices = @transform_6, window_bounds = array<i64: 1, 32, 32>}, {transform_indices = @transform_7, window_bounds = array<i64: 1, 1, 32>}, {pipeline_mode = #tpu.pipeline_mode<synchronous>, transform_indices = @transform_8, window_bounds = array<i64: 32, 32>}, {pipeline_mode = #tpu.pipeline_mode<synchronous>, transform_indices = @transform_9, window_bounds = array<i64: 1, 32>}, {pipeline_mode = #tpu.pipeline_mode<synchronous>, transform_indices = @transform_10, window_bounds = array<i64: 1, 32>}, {pipeline_mode = #tpu.pipeline_mode<synchronous>, transform_indices = @transform_11, window_bounds = array<i64: 1, 32>}, {transform_indices = @transform_12, window_bounds = array<i64: 1, 8, 32>}, {transform_indices = @transform_13, window_bounds = array<i64: 1, 4, 8, 8>}]} {
    %c0_i32 = arith.constant 0 : i32
    %0 = arith.cmpi eq, %arg1, %c0_i32 : i32
    %1 = arith.extui %0 : i1 to i32
    %c0_i32_0 = arith.constant 0 : i32
    %2 = arith.cmpi ne, %1, %c0_i32_0 : i32
    scf.if %2 {
      %c0_38 = arith.constant 0 : index
      %c0_39 = arith.constant 0 : index
      %c0_40 = arith.constant 0 : index
      %56 = vector.load %arg2[%c0_38, %c0_39, %c0_40] : memref<1x8x32xf32, #tpu.memory_space<vmem>>, vector<1x8x32xf32>
      %57 = vector.shape_cast %56 : vector<1x8x32xf32> to vector<8x32xf32>
      %c0_41 = arith.constant 0 : index
      %c0_42 = arith.constant 0 : index
      %58 = vector.load %arg16[%c0_41, %c0_42] : memref<8x32xf32, #tpu.memory_space<vmem>>, vector<8x32xf32>
      tpu.vector_store %arg16[%c0_41, %c0_42], %57 {strides = array<i32>} : memref<8x32xf32, #tpu.memory_space<vmem>>, vector<8x32xf32>,
    } else {
    }
    %c0 = arith.constant 0 : index
    %c0_1 = arith.constant 0 : index
    %3 = vector.load %arg16[%c0, %c0_1] : memref<8x32xf32, #tpu.memory_space<vmem>>, vector<8x32xf32>
    %c0_2 = arith.constant 0 : index
    %c0_3 = arith.constant 0 : index
    %c0_4 = arith.constant 0 : index
    %c0_5 = arith.constant 0 : index
    %4 = vector.load %arg3[%c0_2, %c0_3, %c0_4, %c0_5] : memref<1x1x1x8xf32, #tpu.memory_space<vmem>>, vector<1x1x1x8xf32>
    %5 = vector.shape_cast %4 : vector<1x1x1x8xf32> to vector<1x8xf32>
    %c0_6 = arith.constant 0 : index
    %c0_7 = arith.constant 0 : index
    %c0_8 = arith.constant 0 : index
    %6 = vector.load %arg4[%c0_6, %c0_7, %c0_8] : memref<1x32x32xf32, #tpu.memory_space<vmem>>, vector<1x32x32xf32>
    %7 = vector.shape_cast %6 : vector<1x32x32xf32> to vector<32x32xf32>
    %cst = arith.constant dense<0.000000e+00> : vector<8x32xf32>
    %8 = tpu.matmul %3, %7, %cst {dimension_numbers = #tpu.dot_dimension_numbers<[1], [0], [0], [1], [0, 0, 1, 1], [], []>} : vector<8x32xf32>, vector<32x32xf32>, vector<8x32xf32> -> vector<8x32xf32>
    %c0_9 = arith.constant 0 : index
    %c0_10 = arith.constant 0 : index
    %c0_11 = arith.constant 0 : index
    %9 = vector.load %arg5[%c0_9, %c0_10, %c0_11] : memref<1x1x32xf32, #tpu.memory_space<vmem>>, vector<1x1x32xf32>
    %10 = vector.shape_cast %9 : vector<1x1x32xf32> to vector<1x32xf32>
    %11 = vector.broadcast %10 : vector<1x32xf32> to vector<8x32xf32>
    %12 = arith.addf %8, %11 : vector<8x32xf32>
    %c0_12 = arith.constant 0 : index
    %c0_13 = arith.constant 0 : index
    %c0_14 = arith.constant 0 : index
    %13 = vector.load %arg6[%c0_12, %c0_13, %c0_14] : memref<1x32x32xf32, #tpu.memory_space<vmem>>, vector<1x32x32xf32>
    %14 = vector.shape_cast %13 : vector<1x32x32xf32> to vector<32x32xf32>
    %cst_15 = arith.constant dense<0.000000e+00> : vector<8x32xf32>
    %15 = tpu.matmul %3, %14, %cst_15 {dimension_numbers = #tpu.dot_dimension_numbers<[1], [0], [0], [1], [0, 0, 1, 1], [], []>} : vector<8x32xf32>, vector<32x32xf32>, vector<8x32xf32> -> vector<8x32xf32>
    %c0_16 = arith.constant 0 : index
    %c0_17 = arith.constant 0 : index
    %c0_18 = arith.constant 0 : index
    %16 = vector.load %arg7[%c0_16, %c0_17, %c0_18] : memref<1x1x32xf32, #tpu.memory_space<vmem>>, vector<1x1x32xf32>
    %17 = vector.shape_cast %16 : vector<1x1x32xf32> to vector<1x32xf32>
    %18 = vector.broadcast %17 : vector<1x32xf32> to vector<8x32xf32>
    %19 = arith.addf %15, %18 : vector<8x32xf32>
    %c0_19 = arith.constant 0 : index
    %c0_20 = arith.constant 0 : index
    %c0_21 = arith.constant 0 : index
    %20 = vector.load %arg8[%c0_19, %c0_20, %c0_21] : memref<1x32x32xf32, #tpu.memory_space<vmem>>, vector<1x32x32xf32>
    %21 = vector.shape_cast %20 : vector<1x32x32xf32> to vector<32x32xf32>
    %cst_22 = arith.constant dense<0.000000e+00> : vector<8x32xf32>
    %22 = tpu.matmul %3, %21, %cst_22 {dimension_numbers = #tpu.dot_dimension_numbers<[1], [0], [0], [1], [0, 0, 1, 1], [], []>} : vector<8x32xf32>, vector<32x32xf32>, vector<8x32xf32> -> vector<8x32xf32>
    %c0_23 = arith.constant 0 : index
    %c0_24 = arith.constant 0 : index
    %c0_25 = arith.constant 0 : index
    %23 = vector.load %arg9[%c0_23, %c0_24, %c0_25] : memref<1x1x32xf32, #tpu.memory_space<vmem>>, vector<1x1x32xf32>
    %24 = vector.shape_cast %23 : vector<1x1x32xf32> to vector<1x32xf32>
    %25 = vector.broadcast %24 : vector<1x32xf32> to vector<8x32xf32>
    %26 = arith.addf %22, %25 : vector<8x32xf32>
    %27 = vector.shape_cast %12 : vector<8x32xf32> to vector<8x4x8xf32>
    %28 = vector.shape_cast %19 : vector<8x32xf32> to vector<8x4x8xf32>
    %29 = vector.shape_cast %26 : vector<8x32xf32> to vector<8x4x8xf32>
    "tpu.trace_start"() <{level = 10 : i32, message = "sgd,tgd->gst"}> : () -> ()
    %cst_26 = arith.constant dense<0.000000e+00> : vector<4x8x8xf32>
    %30 = tpu.matmul %27, %28, %cst_26 {dimension_numbers = #tpu.dot_dimension_numbers<[2], [2], [0], [0], [0, 1, 0, 0, 1, 0], [1], [1]>} : vector<8x4x8xf32>, vector<8x4x8xf32>, vector<4x8x8xf32> -> vector<4x8x8xf32>
    "tpu.trace_stop"() : () -> ()
    %31 = vector.shape_cast %5 : vector<1x8xf32> to vector<1x1x8xf32>
    %32 = vector.broadcast %31 : vector<1x1x8xf32> to vector<4x8x8xf32>
    %33 = arith.addf %30, %32 : vector<4x8x8xf32>
    %cst_27 = arith.constant dense<0xFF800000> : vector<4x8xf32>
    %34 = vector.multi_reduction <maximumf>, %33, %cst_27 [2] : vector<4x8x8xf32> to vector<4x8xf32>
    %35 = vector.shape_cast %34 : vector<4x8xf32> to vector<4x8x1xf32>
    %36 = vector.broadcast %35 : vector<4x8x1xf32> to vector<4x8x8xf32>
    %37 = arith.subf %33, %36 : vector<4x8x8xf32>
    %38 = math.exp %37 : vector<4x8x8xf32>
    %cst_28 = arith.constant dense<0.000000e+00> : vector<4x8xf32>
    %39 = vector.multi_reduction <add>, %38, %cst_28 [2] : vector<4x8x8xf32> to vector<4x8xf32>
    %40 = vector.shape_cast %39 : vector<4x8xf32> to vector<4x8x1xf32>
    %41 = tpu.reciprocal %40 : vector<4x8x1xf32> -> vector<4x8x1xf32>
    %42 = vector.broadcast %41 : vector<4x8x1xf32> to vector<4x8x8xf32>
    %43 = arith.mulf %38, %42 : vector<4x8x8xf32>
    %c0_29 = arith.constant 0 : index
    %c0_30 = arith.constant 0 : index
    %c0_31 = arith.constant 0 : index
    %c0_32 = arith.constant 0 : index
    %44 = vector.load %arg15[%c0_29, %c0_30, %c0_31, %c0_32] : memref<1x4x8x8xf32, #tpu.memory_space<vmem>>, vector<1x4x8x8xf32>
    %45 = vector.shape_cast %44 : vector<1x4x8x8xf32> to vector<4x8x8xf32>
    %46 = vector.shape_cast %43 : vector<4x8x8xf32> to vector<1x4x8x8xf32>
    tpu.vector_store %arg15[%c0_29, %c0_30, %c0_31, %c0_32], %46 {strides = array<i32>} : memref<1x4x8x8xf32, #tpu.memory_space<vmem>>, vector<1x4x8x8xf32>,
    "tpu.trace_start"() <{level = 10 : i32, message = "gst,tgd->gsd"}> : () -> ()
    %cst_33 = arith.constant dense<0.000000e+00> : vector<4x8x8xf32>
    %47 = tpu.matmul %38, %29, %cst_33 {dimension_numbers = #tpu.dot_dimension_numbers<[2], [0], [1], [2], [0, 0, 0, 1, 1, 2], [0], [1]>} : vector<4x8x8xf32>, vector<8x4x8xf32>, vector<4x8x8xf32> -> vector<4x8x8xf32>
    "tpu.trace_stop"() : () -> ()
    %48 = vector.broadcast %41 : vector<4x8x1xf32> to vector<4x8x8xf32>
    %49 = arith.mulf %47, %48 : vector<4x8x8xf32>
    %50 = tpu.transpose %49, [1, 0, 2] : vector<4x8x8xf32> -> vector<8x4x8xf32>
    %51 = vector.shape_cast %50 : vector<8x4x8xf32> to vector<8x32xf32>
    %c0_34 = arith.constant 0 : index
    %c0_35 = arith.constant 0 : index
    %52 = vector.load %arg17[%c0_34, %c0_35] : memref<8x32xf32, #tpu.memory_space<vmem>>, vector<8x32xf32>
    tpu.vector_store %arg17[%c0_34, %c0_35], %51 {strides = array<i32>} : memref<8x32xf32, #tpu.memory_space<vmem>>, vector<8x32xf32>,
    %c0_i32_36 = arith.constant 0 : i32
    %53 = arith.cmpi eq, %arg1, %c0_i32_36 : i32
    %54 = arith.extui %53 : i1 to i32
    %c0_i32_37 = arith.constant 0 : i32
    %55 = arith.cmpi ne, %54, %c0_i32_37 : i32
    scf.if %55 {
      %c0_38 = arith.constant 0 : index
      %c0_39 = arith.constant 0 : index
      %56 = vector.load %arg17[%c0_38, %c0_39] : memref<8x32xf32, #tpu.memory_space<vmem>>, vector<8x32xf32>
      %c0_40 = arith.constant 0 : index
      %c0_41 = arith.constant 0 : index
      %57 = vector.load %arg10[%c0_40, %c0_41] : memref<32x32xf32, #tpu.memory_space<vmem>>, vector<32x32xf32>
      %cst_42 = arith.constant dense<0.000000e+00> : vector<8x32xf32>
      %58 = tpu.matmul %56, %57, %cst_42 {dimension_numbers = #tpu.dot_dimension_numbers<[1], [0], [0], [1], [0, 0, 1, 1], [], []>} : vector<8x32xf32>, vector<32x32xf32>, vector<8x32xf32> -> vector<8x32xf32>
      %c0_43 = arith.constant 0 : index
      %c0_44 = arith.constant 0 : index
      %59 = vector.load %arg11[%c0_43, %c0_44] : memref<1x32xf32, #tpu.memory_space<vmem>>, vector<1x32xf32>
      %60 = vector.broadcast %59 : vector<1x32xf32> to vector<8x32xf32>
      %61 = arith.addf %58, %60 : vector<8x32xf32>
      %c0_45 = arith.constant 0 : index
      %c0_46 = arith.constant 0 : index
      %c0_47 = arith.constant 0 : index
      %62 = vector.load %arg2[%c0_45, %c0_46, %c0_47] : memref<1x8x32xf32, #tpu.memory_space<vmem>>, vector<1x8x32xf32>
      %63 = vector.shape_cast %62 : vector<1x8x32xf32> to vector<8x32xf32>
      %64 = arith.addf %61, %63 : vector<8x32xf32>
      %cst_48 = arith.constant dense<0.000000e+00> : vector<8xf32>
      %65 = vector.multi_reduction <add>, %64, %cst_48 [1] : vector<8x32xf32> to vector<8xf32>
      %66 = vector.shape_cast %65 : vector<8xf32> to vector<8x1xf32>
      %cst_49 = arith.constant 3.200000e+01 : f32
      %67 = vector.broadcast %cst_49 : f32 to vector<8x1xf32>
      %68 = arith.divf %66, %67 : vector<8x1xf32>
      %69 = vector.broadcast %68 : vector<8x1xf32> to vector<8x32xf32>
      %70 = arith.subf %64, %69 : vector<8x32xf32>
      %71 = vector.broadcast %68 : vector<8x1xf32> to vector<8x32xf32>
      %72 = arith.subf %64, %71 : vector<8x32xf32>
      %73 = arith.mulf %70, %72 : vector<8x32xf32>
      %cst_50 = arith.constant dense<0.000000e+00> : vector<8xf32>
      %74 = vector.multi_reduction <add>, %73, %cst_50 [1] : vector<8x32xf32> to vector<8xf32>
      %75 = vector.shape_cast %74 : vector<8xf32> to vector<8x1xf32>
      %cst_51 = arith.constant 3.200000e+01 : f32
      %76 = vector.broadcast %cst_51 : f32 to vector<8x1xf32>
      %77 = arith.divf %75, %76 : vector<8x1xf32>
      %78 = vector.broadcast %68 : vector<8x1xf32> to vector<8x32xf32>
      %79 = arith.subf %64, %78 : vector<8x32xf32>
      %cst_52 = arith.constant 9.99999996E-13 : f32
      %80 = vector.broadcast %cst_52 : f32 to vector<8x1xf32>
      %81 = arith.addf %77, %80 : vector<8x1xf32>
      %82 = math.rsqrt %81 : vector<8x1xf32>
      %83 = vector.broadcast %82 : vector<8x1xf32> to vector<8x32xf32>
      %84 = arith.mulf %79, %83 : vector<8x32xf32>
      %c0_53 = arith.constant 0 : index
      %c0_54 = arith.constant 0 : index
      %85 = vector.load %arg12[%c0_53, %c0_54] : memref<1x32xf32, #tpu.memory_space<vmem>>, vector<1x32xf32>
      %86 = vector.broadcast %85 : vector<1x32xf32> to vector<8x32xf32>
      %87 = arith.mulf %84, %86 : vector<8x32xf32>
      %c0_55 = arith.constant 0 : index
      %c0_56 = arith.constant 0 : index
      %88 = vector.load %arg13[%c0_55, %c0_56] : memref<1x32xf32, #tpu.memory_space<vmem>>, vector<1x32xf32>
      %89 = vector.broadcast %88 : vector<1x32xf32> to vector<8x32xf32>
      %90 = arith.addf %87, %89 : vector<8x32xf32>
      %c0_57 = arith.constant 0 : index
      %c0_58 = arith.constant 0 : index
      %c0_59 = arith.constant 0 : index
      %91 = vector.load %arg14[%c0_57, %c0_58, %c0_59] : memref<1x8x32xf32, #tpu.memory_space<vmem>>, vector<1x8x32xf32>
      %92 = vector.shape_cast %91 : vector<1x8x32xf32> to vector<8x32xf32>
      %93 = vector.shape_cast %90 : vector<8x32xf32> to vector<1x8x32xf32>
      tpu.vector_store %arg14[%c0_57, %c0_58, %c0_59], %93 {strides = array<i32>} : memref<1x8x32xf32, #tpu.memory_space<vmem>>, vector<1x8x32xf32>,
    } else {
    }
    return
  }
  func.func @transform_0(%arg0: i32, %arg1: i32) -> (i32, i32, i32) {
    %c0_i32 = arith.constant 0 : i32
    %c0_i32_0 = arith.constant 0 : i32
    %c0_i32_1 = arith.constant 0 : i32
    return %arg0, %c0_i32, %c0_i32_0 : i32, i32, i32
  }
  func.func @transform_1(%arg0: i32, %arg1: i32) -> (i32, i32, i32, i32) {
    %c0_i32 = arith.constant 0 : i32
    %c0_i32_0 = arith.constant 0 : i32
    %c0_i32_1 = arith.constant 0 : i32
    %c0_i32_2 = arith.constant 0 : i32
    return %arg0, %c0_i32, %c0_i32_0, %c0_i32_1 : i32, i32, i32, i32
  }
  func.func @transform_2(%arg0: i32, %arg1: i32) -> (i32, i32, i32) {
    %c0_i32 = arith.constant 0 : i32
    %c0_i32_0 = arith.constant 0 : i32
    %c0_i32_1 = arith.constant 0 : i32
    return %arg1, %c0_i32, %c0_i32_0 : i32, i32, i32
  }
  func.func @transform_3(%arg0: i32, %arg1: i32) -> (i32, i32, i32) {
    %c0_i32 = arith.constant 0 : i32
    %c0_i32_0 = arith.constant 0 : i32
    %c0_i32_1 = arith.constant 0 : i32
    return %arg1, %c0_i32, %c0_i32_0 : i32, i32, i32
  }
  func.func @transform_4(%arg0: i32, %arg1: i32) -> (i32, i32, i32) {
    %c0_i32 = arith.constant 0 : i32
    %c0_i32_0 = arith.constant 0 : i32
    %c0_i32_1 = arith.constant 0 : i32
    return %arg1, %c0_i32, %c0_i32_0 : i32, i32, i32
  }
  func.func @transform_5(%arg0: i32, %arg1: i32) -> (i32, i32, i32) {
    %c0_i32 = arith.constant 0 : i32
    %c0_i32_0 = arith.constant 0 : i32
    %c0_i32_1 = arith.constant 0 : i32
    return %arg1, %c0_i32, %c0_i32_0 : i32, i32, i32
  }
  func.func @transform_6(%arg0: i32, %arg1: i32) -> (i32, i32, i32) {
    %c0_i32 = arith.constant 0 : i32
    %c0_i32_0 = arith.constant 0 : i32
    %c0_i32_1 = arith.constant 0 : i32
    return %arg1, %c0_i32, %c0_i32_0 : i32, i32, i32
  }
  func.func @transform_7(%arg0: i32, %arg1: i32) -> (i32, i32, i32) {
    %c0_i32 = arith.constant 0 : i32
    %c0_i32_0 = arith.constant 0 : i32
    %c0_i32_1 = arith.constant 0 : i32
    return %arg1, %c0_i32, %c0_i32_0 : i32, i32, i32
  }
  func.func @transform_8(%arg0: i32, %arg1: i32) -> (i32, i32) {
    %c0_i32 = arith.constant 0 : i32
    %c0_i32_0 = arith.constant 0 : i32
    %c0_i32_1 = arith.constant 0 : i32
    return %c0_i32, %c0_i32_0 : i32, i32
  }
  func.func @transform_9(%arg0: i32, %arg1: i32) -> (i32, i32) {
    %c0_i32 = arith.constant 0 : i32
    %c0_i32_0 = arith.constant 0 : i32
    %c0_i32_1 = arith.constant 0 : i32
    return %c0_i32, %c0_i32_0 : i32, i32
  }
  func.func @transform_10(%arg0: i32, %arg1: i32) -> (i32, i32) {
    %c0_i32 = arith.constant 0 : i32
    %c0_i32_0 = arith.constant 0 : i32
    %c0_i32_1 = arith.constant 0 : i32
    return %c0_i32, %c0_i32_0 : i32, i32
  }
  func.func @transform_11(%arg0: i32, %arg1: i32) -> (i32, i32) {
    %c0_i32 = arith.constant 0 : i32
    %c0_i32_0 = arith.constant 0 : i32
    %c0_i32_1 = arith.constant 0 : i32
    return %c0_i32, %c0_i32_0 : i32, i32
  }
  func.func @transform_12(%arg0: i32, %arg1: i32) -> (i32, i32, i32) {
    %c0_i32 = arith.constant 0 : i32
    %c0_i32_0 = arith.constant 0 : i32
    %c0_i32_1 = arith.constant 0 : i32
    return %arg0, %c0_i32, %c0_i32_0 : i32, i32, i32
  }
  func.func @transform_13(%arg0: i32, %arg1: i32) -> (i32, i32, i32, i32) {
    %c0_i32 = arith.constant 0 : i32
    %c0_i32_0 = arith.constant 0 : i32
    %c0_i32_1 = arith.constant 0 : i32
    return %arg0, %arg1, %c0_i32, %c0_i32_0 : i32, i32, i32, i32
  }
}

</mosaic_0001>

<bundles_post_ra>
// kernel: tpu_custom_call.1
= control target key start
LH: loop header
LB: loop body
LE: loop exit
PB: predicated region body
PF: predicated region fallthrough
CT: control target
= control target key end

     0   :  { %s3292_s0 = inlined_call_operand.hbm [shape: f32[2,8,32], index: 0, kind: input, shape index: {}]   ;;  %s3293_s1 = inlined_call_operand.hbm [shape: f32[2,1,1,8], index: 1, kind: input, shape index: {}]   ;;  %s3294_s2 = inlined_call_operand.hbm [shape: f32[1,32,32], index: 2, kind: input, shape index: {}]   ;;  %s3295_s3 = inlined_call_operand.vmem [shape: f32[1,1,32], index: 3, kind: input, shape index: {}]   ;;  %s3296_s4 = inlined_call_operand.hbm [shape: f32[1,32,32], index: 4, kind: input, shape index: {}]   ;;  %s3297_s5 = inlined_call_operand.vmem [shape: f32[1,1,32], index: 5, kind: input, shape index: {}]   ;;  %s3298_s6 = inlined_call_operand.hbm [shape: f32[1,32,32], index: 6, kind: input, shape index: {}]   ;;  %s3299_s7 = inlined_call_operand.vmem [shape: f32[1,1,32], index: 7, kind: input, shape index: {}]   ;;  %s3300_s8 = inlined_call_operand.hbm [shape: f32[32,32], index: 8, kind: input, shape index: {}]   ;;  %s3301_s9 = inlined_call_operand.vmem [shape: f32[1,32], index: 9, kind: input, shape index: {}]   ;;  %s3302_s10 = inlined_call_operand.vmem [shape: f32[1,32], index: 10, kind: input, shape index: {}]   ;;  %s3303_s11 = inlined_call_operand.vmem [shape: f32[1,32], index: 11, kind: input, shape index: {}]   ;;  %s3304_s12 = inlined_call_operand.hbm [shape: f32[2,8,32], index: 12, kind: output, shape index: {0}]   ;;  %s3305_s13 = inlined_call_operand.hbm [shape: f32[2,4,8,8], index: 13, kind: output, shape index: {1}]  }
   0x1   :  { %3313 = sst [smem:[#allocation31_spill]] %s3292_s0 }
   0x2   :  { %3314 = sst [smem:[#allocation32_spill]] %s3294_s2 }
   0x3   :  { %3315 = sst [smem:[#allocation33_spill]] %s3296_s4 }
   0x4   :  { %3316 = sst [smem:[#allocation34_spill]] %s3298_s6 }
   0x5   :  { %3317 = sst [smem:[#allocation35_spill]] %s3300_s8 }
   0x6   :  { %3318 = sst [smem:[#allocation36_spill]] %s3303_s11 }
   0x7   :  { %3319 = sst [smem:[#allocation37_spill]] %s3304_s12 }
   0x8   :  { %19 = vsyncpa [#allocation5], 0 }
   0x9   :  { %21 = vsyncpa [#allocation5 + $0x1], 0 }
   0xa   :  { %22 = vsyncpa [#allocation8], 0 }
   0xb   :  { %24 = vsyncpa [#allocation8 + $0x1], 0 }
   0xc   :  { %25 = vsyncpa [#allocation11], 0 }
   0xd   :  { %26 = vsyncpa [#allocation14], 0 }
   0xe   :  { %27 = vsyncpa [#allocation6], 0 }
   0xf   :  { %29 = vsyncpa [#allocation6 + $0x1], 0 }
  0x10   :  { %30 = vsyncpa [#allocation17], 0 }
  0x11   :  { %32 = vsyncpa [#allocation17 + $0x1], 0  ;;  %s2909_s25 = smov 0   ;;  %s2911_s26 = smov 0  }
  0x12   :  { %s2913_s27 = smov 0   ;;  %s2915_s28 = smov 0  }
  0x13   :  { %s2917_s29 = smov 0   ;;  %s2919_s30 = smov 0  }
  0x14 LB: > { %3320 = sst [smem:[#allocation25_spill]] %s2796_s25  ;;  %s2940_s14 = sadd.s32 4294967295, %s2816_s30   ;;  %s2816_s30 = sphi %s2919_s30, %s38_s30   ;;  %s2812_s29 = sphi %s2917_s29, %s3350_s29   ;;  %s2808_s28 = sphi %s2915_s28, %s3349_s28   ;;  %s2804_s27 = sphi %s2913_s27, %s3345_s27   ;;  %s2800_s26 = sphi %s2911_s26, %s3348_s26   ;;  %s2796_s25 = sphi %s2909_s25, %s3347_s25  }
  0x15   : > { %3321 = sst [smem:[#allocation26_spill]] %s2804_s27  ;;  %p2217_p0 = scmp.ge.s32.totalorder %s2816_s30, 1 }
  0x16   : > { %3322 = sst [smem:[#allocation27_spill]] %s2816_s30  ;;  %p71_p1 = scmp.eq.s32.totalorder %s2940_s14, 0 }
  0x17   : > { %p401_p2 = scmp.lt.s32.totalorder %s2816_s30, 3  ;;  %s2818_s16 = smov [#allocation9]  }
  0x18   : > { %s416_s17 = sshll.u32 %s2818_s16, 4  ;;  %s2819_s19 = smov [#allocation10]   ;;  %s417_s17 = int_to_ptr.vmem [resolvable:$true] %s416_s17 }
  0x19   : > { %p2945_p3 = pnand %p2217_p0, %p401_p2  ;;  %s438_s20 = sshll.u32 %s2819_s19, 4  ;;  %s439_s20 = int_to_ptr.vmem [resolvable:$true] %s438_s20 }
  0x1a   : > { %s2820_s21 = smov [#allocation12]   ;;  %s2541_s23 = scalar_lea.vmem %s417_s17, 512 }
  0x1b   : > { %p2410_p4 = pneg %p2945_p3  ;;  %s460_s22 = sshll.u32 %s2820_s21, 4  ;;  %s461_s22 = int_to_ptr.vmem [resolvable:$true] %s460_s22 }
  0x1c   : > { %p2542_p8 = scmp.ne.s32.totalorder %s417_s17, %s2541_s23  ;;  %p2549_p11 = scmp.lt.s32.totalorder %s417_s17, %s417_s17 }
  0x1d   : > { %p2954_p6 = pnand %p2410_p4, %p71_p1  ;;  %p2550_p12 = scmp.lt.s32.totalorder %s2541_s23, %s2541_s23 }
  0x1f   : > { %p2532_p7 = pneg %p2954_p6  ;;  %p2551_p13 = por %p2550_p12, %p2549_p11 }
  0x21   : > { %p2544_p9 = pnand %p2542_p8, %p2532_p7 }
  0x23   : > { %p2545_p10 = pneg %p2544_p9 }
  0x25   : > { %p2552_p0 = pnand %p2551_p13, %p2545_p10 }
  0x27   : > { %2555 = shalt.err (!%p2552_p0)
}
  0x28   : > { %s2821_s24 = smov 128   ;;  %s2822_s16 = smov 8  }
  0x29   : > { %s3325_s2 = sld [smem:[#allocation32_spill]]  ;;  %s2567_s12 = scalar_lea.vmem %s439_s20, 512 }
  0x2a   : > { %p2568_p2 = scmp.ne.s32.totalorder %s439_s20, %s2567_s12  ;;  %p2575_p9 = scmp.lt.s32.totalorder %s439_s20, %s439_s20 }
  0x2b   : > { %p2576_p10 = scmp.lt.s32.totalorder %s2567_s12, %s2567_s12 }
  0x2c   : > { %p2570_p4 = pnand %p2568_p2, %p2532_p7 }
  0x2d   : > { %p2577_p11 = por %p2576_p10, %p2575_p9 }
  0x2e   : > { %p2571_p8 = pneg %p2570_p4 }
  0x2f   : > { %2413 = dma.hbm_to_vmem [thread:$0]  (!%p2954_p6), %s3325_s2, 512, %s417_s17, [#allocation8], %s2821_s24, %s2821_s24, %s2822_s16  }
  0x30   : > { %p2578_p12 = pnand %p2577_p11, %p2571_p8 }
  0x32   : > { %2581 = shalt.err (!%p2578_p12)
}
  0x33   : > { %s3326_s4 = sld [smem:[#allocation33_spill]]  ;;  %s2593_s17 = scalar_lea.vmem %s461_s22, 512 }
  0x34   : > { %p2594_p13 = scmp.ne.s32.totalorder %s461_s22, %s2593_s17  ;;  %p2601_p4 = scmp.lt.s32.totalorder %s461_s22, %s461_s22 }
  0x35   : > { %p2602_p8 = scmp.lt.s32.totalorder %s2593_s17, %s2593_s17 }
  0x36   : > { %p2596_p0 = pnand %p2594_p13, %p2532_p7 }
  0x37   : > { %p2603_p9 = por %p2602_p8, %p2601_p4 }
  0x38   : > { %p2597_p2 = pneg %p2596_p0 }
  0x39   : > { %2416 = dma.hbm_to_vmem [thread:$0]  (!%p2954_p6), %s3326_s4, 512, %s439_s20, [#allocation11], %s2821_s24, %s2821_s24, %s2822_s16  }
  0x3a   : > { %p2604_p10 = pnand %p2603_p9, %p2597_p2 }
  0x3c   : > { %2607 = shalt.err (!%p2604_p10)
}
  0x3d   : > { %s3327_s6 = sld [smem:[#allocation34_spill]]  ;;  %s2823_s20 = smov [#allocation13]  }
  0x3e   : > { %s479_s19 = sshll.u32 %s2823_s20, 4  ;;  %s480_s19 = int_to_ptr.vmem [resolvable:$true] %s479_s19 }
  0x3f   : > { %s2619_s21 = scalar_lea.vmem %s480_s19, 512  ;;  %p2627_p0 = scmp.lt.s32.totalorder %s480_s19, %s480_s19 }
  0x40   : > { %p2620_p11 = scmp.ne.s32.totalorder %s480_s19, %s2619_s21  ;;  %p2628_p2 = scmp.lt.s32.totalorder %s2619_s21, %s2619_s21 }
  0x42   : > { %p2622_p12 = pnand %p2620_p11, %p2532_p7  ;;  %p2629_p4 = por %p2628_p2, %p2627_p0 }
  0x43   : > { %2419 = dma.hbm_to_vmem [thread:$0]  (!%p2954_p6), %s3327_s6, 512, %s461_s22, [#allocation11], %s2821_s24, %s2821_s24, %s2822_s16  }
  0x44   : > { %p2623_p13 = pneg %p2622_p12 }
  0x46   : > { %p2630_p8 = pnand %p2629_p4, %p2623_p13 }
  0x48   : > { %2633 = shalt.err (!%p2630_p8)
}
  0x49   : > { %s3328_s8 = sld [smem:[#allocation35_spill]]  ;;  %s2216_s18 = sadd.s32 4294967294, %s2816_s30  }
  0x4a   : > { %s50_s17 = sadd.s32 1, %s2812_s29  ;;  %s57_s11 = sadd.s32 1, %s2804_s27 }
  0x4b   : > { %p52_p7 = scmp.ge.s32.totalorder %s50_s17, 2  ;;  %p64_p9 = scmp.ne.s32.totalorder %s2804_s27, %s2800_s26 }
  0x4c   : > { %p65_p10 = scmp.eq.s32.totalorder %s2816_s30, 0  ;;  %p70_p12 = scmp.ne.s32.totalorder %s2800_s26, %s2796_s25 }
  0x4d   : > { %s3352_s17 = smov (%p52_p7, %s50_s17), 0  ;;  %p366_p4 = scmp.eq.s32.totalorder %s2216_s18, 1 }
  0x4e   : > { %3329 = sst [smem:[#allocation28_spill]] %s3352_s17  ;;  %p3012_p11 = por %p65_p10, %p64_p9 }
  0x4f   : > { %2422 = dma.hbm_to_vmem [thread:$0]  (!%p2954_p6), %s3328_s8, 512, %s480_s19, [#allocation14], %s2821_s24, %s2821_s24, %s2822_s16  }
  0x50   : > { %s54_s24 = ssub.s32 %s2812_s29, %s3352_s17  ;;  %p360_p6 = scmp.eq.s32.totalorder %s2940_s14, 1 }
  0x51   : > { %p55_p13 = scmp.eq.s32.totalorder %s54_s24, 0  ;;  %p3023_p0 = por %p71_p1, %p70_p12 }
  0x52   : > { %p3027_p2 = por %p360_p6, %p64_p9  ;;  %p3034_p8 = por %p366_p4, %p70_p12 }
  0x53   : > { %s3032_s19 = scalar_select %p55_p13, %s2804_s27, %s57_s11  }
  0x54   : > { %s3334_s21 = scalar_select %p3034_p8, 1, 0 }
  0x55   : > { %3333 = sst [smem:[#allocation29_spill]] %s3032_s19  ;;  %p2441_p7 = scmp.lt.s32.totalorder %s2816_s30, 2 }
  0x56   : > { %3335 = sst [smem:[#allocation30_spill]] %s3334_s21  ;;  %s502_s22 = sand.u32 1, %s2804_s27  }
  0x57   : > { %s2227_s23 = sshll.u32 %s2812_s29, 7  ;;  %s2226_s24 = sshll.u32 %s502_s22, 3 }
  0x58   : > { %s3336_s0 = sld [smem:[#allocation31_spill]]  ;;  %s506_s8 = scalar_lea.vmem [#allocation4], %s2226_s24 }
  0x59   : > { %s513_s17 = sshll.u32 %s506_s8, 4  ;;  %p3046_p9 = pnand %p2441_p7, %p3012_p11  ;;  %s514_s17 = int_to_ptr.vmem [resolvable:$true] %s513_s17 }
  0x5a   : > { %s520_s18 = sand.u32 1, %s2816_s30   ;;  %s503_s11 = scalar_lea.sflag [#allocation5], %s502_s22 }
  0x5b   : > { %p2636_p10 = pneg %p3046_p9  ;;  %s2647_s19 = scalar_lea.vmem %s514_s17, 128 }
  0x5c   : > { %p2648_p12 = scmp.ne.s32.totalorder %s514_s17, %s2647_s19  ;;  %s2824_s2 = smov [#allocation4]  }
  0x5d   : > { %s2652_s4 = sshll.u32 %s2824_s2, 4  ;;  %s2653_s4 = int_to_ptr.vmem [resolvable:$false] %s2652_s4 }
  0x5e   : > { %s511_s6 = scalar_lea.hbm %s3336_s0, %s2227_s23  ;;  %p2650_p6 = pnand %p2648_p12, %p2636_p10 }
  0x5f   : > { %s2654_s8 = scalar_lea.vmem %s2653_s4, 256  ;;  %p2655_p11 = scmp.lt.s32.totalorder %s514_s17, %s2653_s4 }
  0x60   : > { %p2651_p13 = pneg %p2650_p6  ;;  %p2656_p4 = scmp.lt.s32.totalorder %s2654_s8, %s2647_s19 }
  0x62   : > { %p2657_p7 = por %p2656_p4, %p2655_p11 }
  0x64   : > { %p2658_p5 = pnand %p2657_p7, %p2651_p13 }
  0x66   : > { %2661 = shalt.err (!%p2658_p5)
}
  0x67   : > { %2426 = dma.hbm_to_vmem [thread:$0]  (!%p3046_p9), %s511_s6, 128, %s514_s17, %s503_s11  }
  0x68   : > { %s2228_s12 = sshll.u32 %s2812_s29, 4  ;;  %s523_s27 = scalar_lea.vmem [#allocation7], %s502_s22 }
  0x69   : > { %s528_s0 = scalar_lea.hbm %s3293_s1, %s2228_s12  ;;  %s530_s30 = sshll.u32 %s523_s27, 4  ;;  %s531_s30 = int_to_ptr.vmem [resolvable:$true] %s530_s30 }
  0x6a   : > { %s521_s2 = scalar_lea.sflag [#allocation8], %s520_s18  ;;  %s2675_s21 = scalar_lea.vmem %s531_s30, 16 }
  0x6b   : > { %p2676_p12 = scmp.ne.s32.totalorder %s531_s30, %s2675_s21  ;;  %s2825_s19 = smov [#allocation7]  }
  0x6c   : > { %s2680_s4 = sshll.u32 %s2825_s19, 4  ;;  %s2681_s4 = int_to_ptr.vmem [resolvable:$false] %s2680_s4 }
  0x6d   : > { %p2678_p6 = pnand %p2676_p12, %p2636_p10  ;;  %s2682_s8 = scalar_lea.vmem %s2681_s4, 32 }
  0x6e   : > { %p2683_p13 = scmp.lt.s32.totalorder %s531_s30, %s2681_s4  ;;  %p2684_p11 = scmp.lt.s32.totalorder %s2682_s8, %s2675_s21 }
  0x6f   : > { %p2679_p5 = pneg %p2678_p6 }
  0x70   : > { %p2685_p4 = por %p2684_p11, %p2683_p13 }
  0x72   : > { %p2686_p7 = pnand %p2685_p4, %p2679_p5 }
  0x74   : > { %2689 = shalt.err (!%p2686_p7)
}
  0x75   : > { %2429 = dma.hbm_to_vmem [thread:$0]  (!%p3046_p9), %s528_s0, 16, %s531_s30, %s521_s2  }
  0x76   : > { %539 = sbr.rel (%p2945_p3) target bundleno = 1799 (0x707), region = 68  ;;  %s3070_s6 = sand.u32 (!%p2945_p3), 1, %s2800_s26  }
  0x77   : > { %s2230_s27 = sshll.u32 (!%p2945_p3), %s3070_s6, 3  ;;  %s542_s17 = scalar_lea.sflag (!%p2945_p3), [#allocation5], %s3070_s6 }
  0x78   : > { %s545_s21 = scalar_lea.vmem (!%p2945_p3), [#allocation4], %s2230_s27 }
  0x7b   : > { %2767 = dma.done.wait (%p3023_p0), %s542_s17, 128  }
  0x7c   : > { %2769 = vsyncadd (%p3023_p0), %s542_s17, 4294967168  ;;  %s550_s0 = sand.u32 1, %s2940_s14   ;;  %s553_s30 = scalar_lea.vmem [#allocation7], %s3070_s6 }
  0x7d   : > { %s551_s25 = scalar_lea.sflag [#allocation8], %s550_s0 }
  0x7e   : > { %2771 = dma.done.wait (%p3023_p0), %s551_s25, 16  }
  0x7f   : > { %2773 = vsyncadd (%p3023_p0), %s551_s25, 4294967280 }
  0x80   : > { %2775 = dma.done.wait (%p71_p1), [#allocation8], 512  }
  0x81   : > { %2777 = vsyncadd (%p71_p1), [#allocation8], 4294966784 }
  0x82   : > { %2779 = dma.done.wait (%p71_p1), [#allocation11], 1024  }
  0x83   : > { %2781 = vsyncadd (%p71_p1), [#allocation11], 4294966272 }
  0x84   : > { %2783 = dma.done.wait (%p71_p1), [#allocation14], 512  }
  0x85   : > { %2785 = vsyncadd (%p71_p1), [#allocation14], 4294966784  ;;  %v2826_v0 = vmov 0.0   ;;  %vm2827_vm0 = vmmov 0   ;;  %vm645_vm1 = vcmask 261120   ;;  %v737_v1 = vld [vmem:[#allocation10 + $0x18] sm:$0xff] }
  0x86   : > { %2313 = vmatprep.subr.mxu1 %v2826_v0  ;;  %2321 = vmatprep.mubr.msk.f32.mxu1 %vm2827_vm0, %v2826_v0  ;;  %v736_v2 = vld [vmem:[#allocation10 + $0x10] sm:$0xff]  ;;  %v652_v4 = vld [vmem:[#allocation9 + $0x18] sm:$0xff]  ;;  %v735_v5 = vld [vmem:[#allocation10 + $0x8] sm:$0xff]  ;;  %s2828_s18 = smov 104   ;;  %s2829_s11 = smov 120   ;;  %vm1057_vm2 = vcmask 64512  }
  0x87   : > { %2302 = vmatprep.subr.mxu0 %v2826_v0  ;;  %2310 = vmatprep.mubr.msk.f32.mxu0 %vm2827_vm0, %v2826_v0  ;;  %v3104_v3 = vld [vmem:[%s545_s21] sm:$0xff]  ;;  %v734_v8 = vld [vmem:[#allocation10] sm:$0xff]  ;;  %v2239_v11 = vld [vmem:[%s3297_s5] ss:$0 sm:$0xff]  ;;  %s2830_s12 = smov 112   ;;  %s2236_s2 = sshll.u32 %s3070_s6, 5 }
  0x88   : > { %2314 = vmatpush3.msra.mxu1 %v737_v1  ;;  %646 = vst.msk [vmem:[#allocation2] sm:$0xff] %vm645_vm1, %v3104_v3  ;;  %2303 = vmatpush3.msra.mxu0 %v652_v4  ;;  %v651_v6 = vld [vmem:[#allocation9 + $0x10] sm:$0xff]  ;;  %v650_v7 = vld [vmem:[#allocation9 + $0x8] sm:$0xff]  ;;  %v649_v9 = vld [vmem:[#allocation9] sm:$0xff]  ;;  %s3187_s19 = scalar_lea.vmem [#allocation16], %s2236_s2  ;;  %s2833_s4 = smov 16  }
  0x89   : > { %2315 = vmatprep.subr.mxu1 %v2826_v0  ;;  %2304 = vmatprep.subr.mxu0 %v2826_v0  ;;  %v2237_v16 = vld [vmem:[%s3295_s3] ss:$0 sm:$0xff]  ;;  %v817_v20 = vld [vmem:[#allocation12 + $0x10] sm:$0xff]  ;;  %v816_v21 = vld [vmem:[#allocation12 + $0x8] sm:$0xff]  ;;  %s2834_s8 = smov 8   ;;  %s2835_s17 = smov 24  }
  0x8a   : > { %2316 = vmatpush3.msra.mxu1 %v736_v2  ;;  %2305 = vmatpush3.msra.mxu0 %v651_v6  ;;  %v818_v19 = vld [vmem:[#allocation12 + $0x18] sm:$0xff]  ;;  %v815_v22 = vld [vmem:[#allocation12] sm:$0xff]  ;;  %vm1839_vm3 = vcmask 130048   ;;  %vm1841_vm4 = vcmask 195584   ;;  %s2265_s25 = sshll.u32 %s2808_s28, 9  ;;  %s1971_s22 = scalar_lea.sflag [#allocation17], %s3070_s6 }
  0x8b   : > { %2317 = vmatprep.subr.mxu1 %v2826_v0  ;;  %2306 = vmatprep.subr.mxu0 %v2826_v0  ;;  %v2241_v29 = vld [vmem:[%s3299_s7] ss:$0 sm:$0xff]  ;;  %s3215_s16 = scalar_lea.hbm %s3305_s13, %s2265_s25 }
  0x8c   : > { %2318 = vmatpush3.msra.mxu1 %v735_v5  ;;  %2307 = vmatpush3.msra.mxu0 %v650_v7  ;;  %v2243_v37 = vld [vmem:[%s553_s30] ss:$0 sm:$0xff]  ;;  %s1999_s30 = sshll.u32 %s3187_s19, 4  ;;  %s3217_s30 = int_to_ptr.vmem [resolvable:$true] %s1999_s30 }
  0x8d   : > { %2319 = vmatprep.subr.mxu1 %v2826_v0  ;;  %2308 = vmatprep.subr.mxu0 %v2826_v0 }
  0x8e   : > { %2320 = vmatpush3.msra.mxu1 %v734_v8  ;;  %2309 = vmatpush3.msra.mxu0 %v649_v9 }
  0x8f   : > { %2335 = vmatprep.subr.mxu1 %v2826_v0  ;;  %v647_v10 = vld [vmem:[#allocation2] sm:$0xff]  ;;  %2324 = vmatprep.subr.mxu0 %v2826_v0 }
  0x90   : > { %2322 = vmatmul.mubr.msk.f32.vlgmr.msra.gmra.mxu1 %vm645_vm1, %v647_v10  ;;  %2311 = vmatmul.mubr.msk.f32.vlgmr.msra.gmra.mxu0 %vm645_vm1, %v647_v10 }
  0x91   : > { %2337 = vmatprep.mubr.msk.f32.mxu1 %vm2827_vm0, %v2826_v0  ;;  %2332 = vmatprep.mubr.msk.f32.mxu0 %vm2827_vm0, %v2826_v0 }
  0x92   : > { %2325 = vmatpush3.msra.mxu0 %v818_v19 }
  0x93   : > { %2326 = vmatprep.subr.mxu0 %v2826_v0 }
  0x94   : > { %2327 = vmatpush3.msra.mxu0 %v817_v20 }
  0x95   : > { %2328 = vmatprep.subr.mxu0 %v2826_v0 }
  0x96   : > { %2329 = vmatpush3.msra.mxu0 %v816_v21 }
  0x97   : > { %2330 = vmatprep.subr.mxu0 %v2826_v0 }
  0x98   : > { %2331 = vmatpush3.msra.mxu0 %v815_v22 }
  0x99   : > { %2333 = vmatmul.mubr.msk.f32.vlgmr.msra.gmra.mxu0 %vm645_vm1, %v647_v10  ;;  %2355 = vmatprep.subr.mxu0 %v2826_v0 }
  0x9a   : > { %2357 = vmatprep.mubr.msk.f32.mxu0 %vm2827_vm0, %v2826_v0 }
 0x150   : > { %v811_v12 = vpop.f32.mrf.mxu1  ;;  %v730_v13 = vpop.f32.mrf.mxu0 }
 0x151   : > { %v812_v14 = vadd.f32 %v2239_v11, %v811_v12  ;;  %v731_v18 = vadd.f32 %v2237_v16, %v730_v13 }
 0x152   : > { %v2323_v15 = vpop.f32.mrf.mxu1  ;;  %v2312_v17 = vpop.f32.mrf.mxu0 }
 0x153   : > { %910 = vrot.lane.b32.xlu1 %v812_v14, %s2828_s18  ;;  %904 = vrot.lane.b32.xlu0 %v812_v14, %s2829_s11 }
 0x157   : > { %907 = vrot.lane.b32.xlu0 %v812_v14, %s2830_s12  ;;  %897 = vrot.lane.b32.xlu1 %v731_v18, %s2829_s11 }
 0x159   : > { %v892_v31 = vpop.f32.mrf.mxu0 }
 0x15a   : > { %v893_v32 = vadd.f32 %v2241_v29, %v892_v31  ;;  %v2831_v31 = vmov 1983009808  }
 0x15b   : > { %899 = vrot.lane.b32.xlu0 %v731_v18, %s2830_s12  ;;  %901 = vrot.lane.b32.xlu1 %v731_v18, %s2828_s18  ;;  %v2334_v33 = vpop.f32.mrf.mxu0 }
 0x15c   : > { %2356 = vmatpush3.msra.mxu0 %v893_v32  ;;  %v1695_v33 = vlaneseq }
 0x15d   : > { %2365 = vmatprep.subr.mxu0 %v2826_v0 }
 0x179   : > { %929 = vxpose.xlu0.b32.start.end [1/1] (short) (narrow) %v812_v14, 8 }
 0x1c5   : > { %v905_v23 = vpop.permute.xlu0 %904  ;;  %v911_v25 = vpop.permute.xlu1 %910 }
 0x1c6   : > { %961 = vxpose.xlu1.b32.start.end [1/1] (short) (narrow) %v905_v23, 8 }
 0x1c9   : > { %v908_v24 = vpop.permute.xlu0 %907  ;;  %v898_v28 = vpop.permute.xlu1 %897 }
 0x1ca   : > { %993 = vxpose.xlu0.b32.start.end [1/1] (short) (narrow) %v908_v24, 8 }
 0x1cd   : > { %v900_v26 = vpop.permute.xlu0 %899  ;;  %v902_v30 = vpop.permute.xlu1 %901 }
 0x1ce   : > { %1025 = vxpose.xlu0.b32.start.end [1/1] (short) (narrow) %v911_v25, 8 }
 0x1e4   : > { %914 = vrot.lane.b32.xlu1 %v893_v32, %s2829_s11  ;;  %s2836_s11 = smov [#allocation16]  }
 0x1f5   : > { %v945_v27 = vpop.trf.xlu0 }
 0x1f6   : > { %2336 = vmatpush3.msra.mxu1 %v945_v27 }
 0x1f7   : > { %2338 = vmatmul.mubr.msk.f32.vlgmr.msra.gmra.mxu1 %vm1057_vm2, %v731_v18  ;;  %2340 = vmatprep.subr.mxu1 %v2826_v0 }
 0x1f8   : > { %2342 = vmatprep.mubr.msk.f32.mxu1 %vm2827_vm0, %v2826_v0 }
 0x242   : > { %v977_v34 = vpop.trf.xlu1 }
 0x243   : > { %2341 = vmatpush3.msra.mxu1 %v977_v34 }
 0x244   : > { %2343 = vmatmul.mubr.msk.f32.vlgmr.msra.gmra.mxu1 %vm1057_vm2, %v898_v28  ;;  %2345 = vmatprep.subr.mxu1 %v2826_v0 }
 0x245   : > { %2347 = vmatprep.mubr.msk.f32.mxu1 %vm2827_vm0, %v2826_v0 }
 0x246   : > { %v1009_v35 = vpop.trf.xlu0 }
 0x247   : > { %2346 = vmatpush3.msra.mxu1 %v1009_v35 }
 0x248   : > { %2348 = vmatmul.mubr.msk.f32.vlgmr.msra.gmra.mxu1 %vm1057_vm2, %v900_v26  ;;  %2350 = vmatprep.subr.mxu1 %v2826_v0 }
 0x249   : > { %2352 = vmatprep.mubr.msk.f32.mxu1 %vm2827_vm0, %v2826_v0 }
 0x24a   : > { %v1041_v36 = vpop.trf.xlu0 }
 0x24b   : > { %2351 = vmatpush3.msra.mxu1 %v1041_v36 }
 0x24c   : > { %2353 = vmatmul.mubr.msk.f32.vlgmr.msra.gmra.mxu1 %vm1057_vm2, %v902_v30  ;;  %2360 = vmatprep.subr.mxu1 %v2826_v0 }
 0x24d   : > { %2362 = vmatprep.mubr.msk.f32.mxu1 %vm2827_vm0, %v2826_v0 }
 0x256   : > { %v915_v42 = vpop.permute.xlu1 %914 }
 0x257   : > { %2361 = vmatpush3.msra.mxu1 %v915_v42 }
 0x258   : > { %2370 = vmatprep.subr.mxu1 %v2826_v0 }
 0x2b7   : > { %v1126_v38 = vpop.f32.mrf.mxu1 }
 0x2b8   : > { %v1127_v39 = vadd.f32 %v2243_v37, %v1126_v38  ;;  %v2832_v38 = vmov 1934713408  }
 0x2b9   : > { %v2339_v40 = vpop.f32.mrf.mxu1 }
 0x2ba   : > { %v1346_v41 = vsel %vm1057_vm2, %v1127_v39, -inf }
 0x2bb   : > { %1347 = vmax.xlane.f32.xlu0 %v1346_v41 }
 0x304   : > { %v1198_v43 = vpop.f32.mrf.mxu1 }
 0x305   : > { %v1199_v44 = vadd.f32 %v2243_v37, %v1198_v43 }
 0x306   : > { %v2344_v45 = vpop.f32.mrf.mxu1 }
 0x307   : > { %v1349_v46 = vsel %vm1057_vm2, %v1199_v44, -inf }
 0x308   : > { %v1270_v47 = vpop.f32.mrf.mxu1  ;;  %1350 = vmax.xlane.f32.xlu1 %v1349_v46 }
 0x309   : > { %v1271_v48 = vadd.f32 %v2243_v37, %v1270_v47 }
 0x30a   : > { %v2349_v49 = vpop.f32.mrf.mxu1 }
 0x30b   : > { %v1352_v50 = vsel %vm1057_vm2, %v1271_v48, -inf }
 0x30c   : > { %v1342_v51 = vpop.f32.mrf.mxu1  ;;  %1353 = vmax.xlane.f32.xlu1 %v1352_v50 }
 0x30d   : > { %v1343_v52 = vadd.f32 %v2243_v37, %v1342_v51  ;;  %v1696_v37 = vshrl.u32 %v1695_v33, 7  ;;  %v2254_v33 = vld [vmem:[%s3301_s9] ss:$0 sm:$0xff] }
 0x30e   : > { %v2354_v53 = vpop.f32.mrf.mxu1 }
 0x30f   : > { %v1355_v54 = vsel %vm1057_vm2, %v1343_v52, -inf }
 0x310   : > { %1356 = vmax.xlane.f32.xlu0 %v1355_v54 }
 0x31d   : > { %920 = vrot.lane.b32.xlu1 %v893_v32, %s2828_s18  ;;  %s2690_s18 = scalar_lea.vmem %s3217_s30, 512 }
 0x31e   : > { %p2691_p1 = scmp.ne.s32.totalorder %s3217_s30, %s2690_s18 }
 0x320   : > { %p2692_p3 = pnand %p2691_p1, %p3027_p2 }
 0x322   : > { %p2693_p0 = pneg %p2692_p3 }
 0x326   : > { %917 = vrot.lane.b32.xlu0 %v893_v32, %s2830_s12  ;;  %v1693_v32 = vunpack.c.l.s4 %v2831_v31  ;;  %s2694_s12 = sshll.u32 %s2836_s11, 4  ;;  %s2695_s12 = int_to_ptr.vmem [resolvable:$false] %s2694_s12 }
 0x327   : > { %s2696_s23 = scalar_lea.vmem %s2695_s12, 1024  ;;  %p2697_p9 = scmp.lt.s32.totalorder %s3217_s30, %s2695_s12 }
 0x328   : > { %v1694_v36 = vunpack.c.0.s8 %v1693_v32  ;;  %p2698_p10 = scmp.lt.s32.totalorder %s2696_s23, %s2690_s18 }
 0x32a   : > { %v1697_v42 = vsub.s32 %v1694_v36, %v1696_v37  ;;  %p2699_p12 = por %p2698_p10, %p2697_p9 }
 0x32c   : > { %p2700_p6 = pnand %p2699_p12, %p2693_p0 }
 0x344   : > { %v1348_v55 = vpop.xlane.xlu0 %1347 }
 0x345   : > { %v1358_v56 = vsub.f32 %v1127_v39, %v1348_v55  ;;  %v1725_v39 = vunpack.c.l.s4 %v2832_v38 }
 0x347   : > { %v1362_v57 = vmul.f32 1.442695, %v1358_v56 }
 0x349   : > { %2512 = vpow2.f32 %v1362_v57 }
 0x356   : > { %v2513_v58 = vpop.eup %2512 }
 0x357   : > { %2358 = vmatmul.mubr.msk.f32.vlgmr.msra.gmra.mxu0 %vm1057_vm2, %v2513_v58  ;;  %v1370_v59 = vsel %vm1057_vm2, %v2513_v58, 0.0 }
 0x358   : > { %1371 = vadd.xlane.f32.xlu1 %v1370_v59  ;;  %2367 = vmatprep.mubr.msk.f32.mxu0 %vm2827_vm0, %v2826_v0 }
 0x391   : > { %v1351_v60 = vpop.xlane.xlu1 %1350 }
 0x392   : > { %v1359_v61 = vsub.f32 %v1199_v44, %v1351_v60  ;;  %v1726_v44 = vunpack.c.0.s8 %v1725_v39 }
 0x394   : > { %v1364_v62 = vmul.f32 1.442695, %v1359_v61 }
 0x395   : > { %v1354_v63 = vpop.xlane.xlu1 %1353 }
 0x396   : > { %2514 = vpow2.f32 %v1364_v62  ;;  %v1360_v1 = vsub.f32 %v1271_v48, %v1354_v63 }
 0x398   : > { %v1366_v2 = vmul.f32 1.442695, %v1360_v1 }
 0x399   : > { %v1357_v4 = vpop.xlane.xlu0 %1356  ;;  %v921_v9 = vpop.permute.xlu1 %920 }
 0x39a   : > { %2516 = vpow2.f32 %v1366_v2  ;;  %v1361_v5 = vsub.f32 %v1343_v52, %v1357_v4  ;;  %v1729_v52 = vsub.s32 %v1726_v44, %v1696_v37 }
 0x39c   : > { %v1368_v6 = vmul.f32 1.442695, %v1361_v5 }
 0x39d   : > { %v918_v7 = vpop.permute.xlu0 %917 }
 0x39e   : > { %2518 = vpow2.f32 %v1368_v6  ;;  %2366 = vmatpush3.msra.mxu0 %v918_v7 }
 0x39f   : > { %2375 = vmatprep.subr.mxu0 %v2826_v0 }
 0x3a3   : > { %v2515_v8 = vpop.eup %2514 }
 0x3a4   : > { %2363 = vmatmul.mubr.msk.f32.vlgmr.msra.gmra.mxu1 %vm1057_vm2, %v2515_v8  ;;  %v1373_v10 = vsel %vm1057_vm2, %v2515_v8, 0.0 }
 0x3a5   : > { %2371 = vmatpush3.msra.mxu1 %v921_v9  ;;  %1374 = vadd.xlane.f32.xlu0 %v1373_v10 }
 0x3a6   : > { %2372 = vmatprep.mubr.msk.f32.mxu1 %vm2827_vm0, %v2826_v0 }
 0x3a7   : > { %v2517_v11 = vpop.eup %2516 }
 0x3a8   : > { %2368 = vmatmul.mubr.msk.f32.vlgmr.msra.gmra.mxu0 %vm1057_vm2, %v2517_v11  ;;  %v1376_v12 = vsel %vm1057_vm2, %v2517_v11, 0.0 }
 0x3a9   : > { %1377 = vadd.xlane.f32.xlu0 %v1376_v12  ;;  %2383 = vmatprep.mubr.msk.f32.mxu0 %vm2827_vm0, %v2826_v0  ;;  %v1850_v12 = vld [vmem:[#allocation13 + $0x10] sm:$0xff] }
 0x3ab   : > { %v2519_v13 = vpop.eup %2518 }
 0x3ac   : > { %2373 = vmatmul.mubr.msk.f32.vlgmr.msra.gmra.mxu1 %vm1057_vm2, %v2519_v13  ;;  %v1379_v14 = vsel %vm1057_vm2, %v2519_v13, 0.0 }
 0x3ad   : > { %1380 = vadd.xlane.f32.xlu1 %v1379_v14 }
 0x3e1   : > { %v1372_v15 = vpop.xlane.xlu1 %1371 }
 0x3e2   : > { %2520 = vrcp.f32 %v1372_v15 }
 0x3ef   : > { %v2521_v16 = vpop.eup %2520 }
 0x3f0   : > { %v1386_v17 = vmul.f32 %v2521_v16, %v2513_v58 }
 0x3f2   : > { %1390 = vst.msk [vmem:[%s3187_s19] sm:$0xff] %vm1057_vm2, %v1386_v17  ;;  %v1849_v17 = vld [vmem:[#allocation13 + $0x8] sm:$0xff] }
 0x417   : > { %v1463_v18 = vpop.f32.mrf.mxu0 }
 0x418   : > { %v1686_v19 = vmul.f32 %v2521_v16, %v1463_v18 }
 0x419   : > { %v2359_v20 = vpop.f32.mrf.mxu0 }
 0x42e   : > { %v1375_v21 = vpop.xlane.xlu0 %1374 }
 0x42f   : > { %2522 = vrcp.f32 %v1375_v21 }
 0x432   : > { %v1378_v22 = vpop.xlane.xlu0 %1377 }
 0x433   : > { %2524 = vrcp.f32 %v1378_v22  ;;  %v1848_v22 = vld [vmem:[#allocation13] sm:$0xff] }
 0x436   : > { %v1381_v23 = vpop.xlane.xlu1 %1380 }
 0x437   : > { %2526 = vrcp.f32 %v1381_v23 }
 0x43c   : > { %v2523_v24 = vpop.eup %2522 }
 0x43d   : > { %v1387_v25 = vmul.f32 %v2523_v24, %v2515_v8 }
 0x43f   : > { %1391 = vst.msk [vmem:[%s3187_s19 + $0x8] sm:$0xff] %vm1057_vm2, %v1387_v25 }
 0x440   : > { %v2525_v26 = vpop.eup %2524 }
 0x441   : > { %v1388_v27 = vmul.f32 %v2525_v26, %v2517_v11  ;;  %v1851_v11 = vld [vmem:[#allocation13 + $0x18] sm:$0xff] }
 0x442   : > { %2376 = vmatpush3.msra.mxu0 %v1851_v11 }
 0x443   : > { %1392 = vst.msk [vmem:[%s3187_s19 + $0x10] sm:$0xff] %vm1057_vm2, %v1388_v27  ;;  %2377 = vmatprep.subr.mxu0 %v2826_v0 }
 0x444   : > { %v2527_v28 = vpop.eup %2526  ;;  %2378 = vmatpush3.msra.mxu0 %v1850_v12 }
 0x445   : > { %v1389_v29 = vmul.f32 %v2527_v28, %v2519_v13  ;;  %2379 = vmatprep.subr.mxu0 %v2826_v0 }
 0x446   : > { %2380 = vmatpush3.msra.mxu0 %v1849_v17 }
 0x447   : > { %1393 = vst.msk [vmem:[%s3187_s19 + $0x18] sm:$0xff] %vm1057_vm2, %v1389_v29  ;;  %2381 = vmatprep.subr.mxu0 %v2826_v0 }
 0x448   : > { %2382 = vmatpush3.msra.mxu0 %v1848_v22 }
 0x464   : > { %v1536_v30 = vpop.f32.mrf.mxu1 }
 0x465   : > { %v1687_v45 = vmul.f32 %v2523_v24, %v1536_v30 }
 0x466   : > { %v2364_v34 = vpop.f32.mrf.mxu1 }
 0x468   : > { %v1609_v35 = vpop.f32.mrf.mxu0 }
 0x469   : > { %v1688_v40 = vmul.f32 %v2525_v26, %v1609_v35 }
 0x46a   : > { %v2369_v41 = vpop.f32.mrf.mxu0 }
 0x46b   : > { %v1690_v46 = vcombine.low %v1686_v19, %v1688_v40  ;;  %v1691_v47 = vcombine.high %v1686_v19, %v1688_v40 }
 0x46c   : > { %v1682_v43 = vpop.f32.mrf.mxu1 }
 0x46d   : > { %v1689_v48 = vmul.f32 %v2527_v28, %v1682_v43  ;;  %v1698_v53 = vrot.slane %v1690_v46, %v1697_v42  ;;  %v1705_v54 = vrot.slane %v1691_v47, %v1697_v42 }
 0x46e   : > { %v2374_v49 = vpop.f32.mrf.mxu1 }
 0x46f   : > { %v1706_v50 = vcombine.low %v1687_v45, %v1689_v48  ;;  %v1707_v51 = vcombine.high %v1687_v45, %v1689_v48 }
 0x471   : > { %v1714_v55 = vrot.slane %v1706_v50, %v1697_v42  ;;  %v1721_v56 = vrot.slane %v1707_v51, %v1697_v42 }
 0x473   : > { %v1722_v57 = vcombine.low %v1698_v53, %v1714_v55  ;;  %v1723_v58 = vcombine.high %v1698_v53, %v1714_v55  ;;  %v1738_v59 = vcombine.low %v1705_v54, %v1721_v56  ;;  %v1739_v60 = vcombine.high %v1705_v54, %v1721_v56 }
 0x475   : > { %v1730_v61 = vrot.slane %v1722_v57, %v1729_v52  ;;  %v1737_v62 = vrot.slane %v1723_v58, %v1729_v52  ;;  %v1746_v63 = vrot.slane %v1738_v59, %v1729_v52  ;;  %v1753_v1 = vrot.slane %v1739_v60, %v1729_v52 }
 0x477   : > { %v1758_v2 = vcombine.low %v1730_v61, %v1737_v62  ;;  %v2252_v4 = vcombine.high %v1730_v61, %v1737_v62  ;;  %v1774_v5 = vcombine.low %v1746_v63, %v1753_v1  ;;  %v2253_v6 = vcombine.high %v1746_v63, %v1753_v1 }
 0x479   : > { %v1765_v7 = vrot.slane %v1758_v2, %v1697_v42  ;;  %v1773_v8 = vrot.slane %v2252_v4, %v1697_v42  ;;  %v1781_v9 = vrot.slane %v1774_v5, %v1697_v42  ;;  %v1789_v10 = vrot.slane %v2253_v6, %v1697_v42 }
 0x47b   : > { %v1791_v13 = vcombine.high %v1765_v7, %v1773_v8  ;;  %v1807_v14 = vcombine.high %v1781_v9, %v1789_v10  ;;  %v1790_v15 = vcombine.low %v1765_v7, %v1773_v8  ;;  %v1806_v16 = vcombine.low %v1781_v9, %v1789_v10 }
 0x47d   : > { %v1805_v18 = vrot.slane %v1791_v13, %v1729_v52  ;;  %v1821_v19 = vrot.slane %v1807_v14, %v1729_v52  ;;  %v1798_v20 = vrot.slane %v1790_v15, %v1729_v52  ;;  %v1814_v21 = vrot.slane %v1806_v16, %v1729_v52 }
 0x47f   : > { %v1824_v23 = vcombine.low %v1805_v18, %v1821_v19  ;;  %v1823_v24 = vcombine.high %v1798_v20, %v1814_v21  ;;  %v1822_v25 = vcombine.low %v1798_v20, %v1814_v21  ;;  %v1825_v26 = vcombine.high %v1805_v18, %v1821_v19 }
 0x481   : > { %1831 = vrot.lane.b32.xlu1 %v1824_v23, %s2833_s4  ;;  %1827 = vrot.lane.b32.xlu0 %v1823_v24, %s2834_s8 }
 0x485   : > { %1835 = vrot.lane.b32.xlu1 %v1825_v26, %s2835_s17 }
 0x4f3   : > { %v1832_v27 = vpop.permute.xlu1 %1831  ;;  %v1828_v28 = vpop.permute.xlu0 %1827 }
 0x4f4   : > { %v1838_v29 = vsel %vm1057_vm2, %v1822_v25, %v1828_v28 }
 0x4f5   : > { %v1840_v31 = vsel %vm1839_vm3, %v1838_v29, %v1832_v27 }
 0x4f7   : > { %v1836_v30 = vpop.permute.xlu1 %1835 }
 0x4f8   : > { %v1842_v32 = vsel %vm1841_vm4, %v1840_v31, %v1836_v30 }
 0x4f9   : > { %1843 = vst.msk [vmem:[#allocation3] sm:$0xff] %vm645_vm1, %v1842_v32 }
 0x500   : > { %v1847_v0 = vld [vmem:[#allocation3] sm:$0xff] }
 0x501   : > { %2384 = vmatmul.mubr.msk.f32.vlgmr.msra.gmra.mxu0 %vm645_vm1, %v1847_v0 }
 0x5c1   : > { %v1928_v34 = vpop.f32.mrf.mxu0 }
 0x5c2   : > { %v1929_v35 = vadd.f32 %v2254_v33, %v1928_v34 }
 0x5c3   : > { %v2385_v36 = vpop.f32.mrf.mxu0 }
 0x5c4   : > { %v1933_v37 = vadd.f32 %v1929_v35, %v3104_v3 }
 0x5c6   : > { %v1934_v38 = vsel %vm645_vm1, %v1933_v37, 0.0 }
 0x5c7   : > { %1935 = vadd.xlane.f32.xlu0 %v1934_v38 }
 0x650   : > { %v1936_v39 = vpop.xlane.xlu0 %1935 }
 0x651   : > { %v1938_v40 = vmul.f32 0.03125, %v1936_v39 }
 0x653   : > { %v1939_v41 = vsub.f32 %v1933_v37, %v1938_v40 }
 0x655   : > { %v1940_v42 = vmul.f32 %v1939_v41, %v1939_v41 }
 0x657   : > { %v1941_v43 = vsel %vm645_vm1, %v1940_v42, 0.0 }
 0x658   : > { %1942 = vadd.xlane.f32.xlu1 %v1941_v43 }
 0x659   : > { %2703 = shalt.err (!%p2700_p6)
}
 0x65a   : > { %s2704_s24 = scalar_lea.hbm %s3215_s16, 512  ;;  %s2708_s4 = scalar_lea.hbm %s3305_s13, 1024 }
 0x65b   : > { %p2705_p5 = scmp.ne.s32.totalorder %s3215_s16, %s2704_s24  ;;  %p2709_p4 = scmp.lt.s32.totalorder %s3215_s16, %s3305_s13 }
 0x65c   : > { %p2710_p7 = scmp.lt.s32.totalorder %s2708_s4, %s2704_s24 }
 0x65d   : > { %p2706_p13 = pnand %p2705_p5, %p3027_p2 }
 0x65e   : > { %p2711_p1 = por %p2710_p7, %p2709_p4 }
 0x65f   : > { %p2707_p11 = pneg %p2706_p13 }
 0x661   : > { %p2712_p3 = pnand %p2711_p1, %p2707_p11 }
 0x663   : > { %2715 = shalt.err (!%p2712_p3)
}
 0x664   : > { %s2837_s0 = smov 128   ;;  %v2256_v47 = vld [vmem:[%s3302_s10] ss:$0 sm:$0xff]  ;;  %s3338_s11 = sld [smem:[#allocation36_spill]] }
 0x665   : > { %2407 = dma.vmem_to_hbm [thread:$0]  (%p3027_p2), %s3217_s30, 512, %s3215_s16, %s1971_s22, %s2837_s0, %s2837_s0, %s2834_s8  }
 0x666   : > { %s2260_s12 = sshll.u32 %s2808_s28, 7  ;;  %s622_s23 = scalar_lea.vmem [#allocation15], %s2230_s27 }
 0x667   : > { %s1984_s8 = sshll.u32 %s622_s23, 4  ;;  %s3339_s22 = sld [smem:[#allocation37_spill]]  ;;  %s1985_s8 = int_to_ptr.vmem [resolvable:$true] %s1984_s8 }
 0x668   : > { %s1966_s2 = scalar_lea.sflag [#allocation6], %s3070_s6  ;;  %s2716_s19 = scalar_lea.vmem %s1985_s8, 128 }
 0x669   : > { %p2717_p0 = scmp.ne.s32.totalorder %s1985_s8, %s2716_s19  ;;  %s2838_s4 = smov [#allocation15]  }
 0x66a   : > { %v2257_v49 = vld [vmem:[%s3338_s11] ss:$0 sm:$0xff]  ;;  %s2720_s28 = sshll.u32 %s2838_s4, 4  ;;  %s2721_s28 = int_to_ptr.vmem [resolvable:$false] %s2720_s28 }
 0x66b   : > { %p2718_p9 = pnand %p2717_p0, %p3027_p2  ;;  %s2722_s27 = scalar_lea.vmem %s2721_s28, 256 }
 0x66c   : > { %p2723_p12 = scmp.lt.s32.totalorder %s1985_s8, %s2721_s28  ;;  %p2724_p6 = scmp.lt.s32.totalorder %s2722_s27, %s2716_s19 }
 0x66d   : > { %s1982_s24 = scalar_lea.hbm %s3339_s22, %s2260_s12  ;;  %p2719_p10 = pneg %p2718_p9 }
 0x66e   : > { %p2725_p5 = por %p2724_p6, %p2723_p12 }
 0x670   : > { %p2726_p13 = pnand %p2725_p5, %p2719_p10 }
 0x6e1   : > { %v1943_v3 = vpop.xlane.xlu1 %1942 }
 0x6e2   : > { %v1944_v44 = vmul.f32 0.03125, %v1943_v3 }
 0x6e4   : > { %v1945_v45 = vadd.f32 1e-12, %v1944_v44 }
 0x6e6   : > { %2528 = vrsqrt.f32 %v1945_v45 }
 0x6f3   : > { %v2529_v46 = vpop.eup %2528 }
 0x6f4   : > { %v1947_v48 = vmul.f32 %v2529_v46, %v1939_v41 }
 0x6f6   : > { %v1955_v50 = vmul.f32 %v2256_v47, %v1947_v48 }
 0x6f8   : > { %v1963_v51 = vadd.f32 %v2257_v49, %v1955_v50 }
 0x6fa   : > { %1964 = vst.msk [vmem:[%s622_s23] sm:$0xff] %vm645_vm1, %v1963_v51 }
 0x6fb   : > { %2729 = shalt.err (!%p2726_p13)
}
 0x6fc   : > { %s2730_s17 = scalar_lea.hbm %s1982_s24, 128  ;;  %s2734_s0 = scalar_lea.hbm %s3339_s22, 256 }
 0x6fd   : > { %p2731_p11 = scmp.ne.s32.totalorder %s1982_s24, %s2730_s17  ;;  %p2735_p1 = scmp.lt.s32.totalorder %s1982_s24, %s3339_s22 }
 0x6fe   : > { %p2736_p3 = scmp.lt.s32.totalorder %s2734_s0, %s2730_s17 }
 0x6ff   : > { %p2732_p4 = pnand %p2731_p11, %p3027_p2 }
 0x700   : > { %p2737_p0 = por %p2736_p3, %p2735_p1 }
 0x701   : > { %p2733_p7 = pneg %p2732_p4 }
 0x703   : > { %p2738_p9 = pnand %p2737_p0, %p2733_p7 }
 0x705   : > { %2741 = shalt.err (!%p2738_p9)
}
 0x706   : > { %2406 = dma.vmem_to_hbm [thread:$0]  (%p3027_p2), %s1985_s8, 128, %s1982_s24, %s1966_s2  }
 0x707 PF: > { %s3340_s15 = sld [smem:[#allocation25_spill]] }
 0x708   : > { %s3342_s11 = sld [smem:[#allocation27_spill]] }
 0x70d   : > { %s2014_s12 = sand.u32 1, %s3340_s15  }
 0x70e   : > { %p3343_p10 = scmp.ge.s32.totalorder %s3342_s11, 2  ;;  %s2015_s23 = scalar_lea.sflag [#allocation6], %s2014_s12 }
 0x710   : > { %p2431_p12 = pnand %p3343_p10, %p3034_p8 }
 0x712   : > { %p2432_p6 = pneg %p2431_p12 }
 0x714   : > { %2787 = dma.done.wait (%p2432_p6), %s2015_s23, 128  }
 0x715   : > { %2789 = vsyncadd (%p2432_p6), %s2015_s23, 4294967168  ;;  %s2024_s30 = scalar_lea.sflag [#allocation17], %s2014_s12 }
 0x716   : > { %2791 = dma.done.wait (%p2432_p6), %s2024_s30, 512  }
 0x717   : > { %2793 = vsyncadd (%p2432_p6), %s2024_s30, 4294966784  ;;  %s38_s30 = sadd.s32 1, %s3342_s11   ;;  %s3344_s20 = sld [smem:[#allocation26_spill]] }
 0x718   : > { %p35_p5 = scmp.ge.s32.totalorder %s38_s30, 4   ;;  %s3345_s27 = sld [smem:[#allocation29_spill]] }
 0x719   : > { %s3346_s8 = sld [smem:[#allocation28_spill]]  ;;  %s3347_s25 = smov %s2800_s26 }
 0x71a   : > { %s3349_s28 = smov %s2812_s29 }
 0x71b   :  { %37 = sbr.rel (!%p35_p5) target bundleno = 20 (0x14), region = 179 }
 0x71d   : > { %s3348_s26 = smov %s3344_s20 }
 0x71f   : > { %s3350_s29 = smov %s3346_s8 }
 0x720   :  { %2029 = vsyncpa [#allocation5], 1 }
 0x721   :  { %2031 = vsyncpa [#allocation5 + $0x1], 1 }
 0x722   :  { %2032 = vsyncpa [#allocation8], 1 }
 0x723   :  { %2034 = vsyncpa [#allocation8 + $0x1], 1 }
 0x724   :  { %2035 = vsyncpa [#allocation11], 1 }
 0x725   :  { %2036 = vsyncpa [#allocation14], 1 }
 0x726   :  { %2037 = vsyncpa [#allocation6], 1 }
 0x727   :  { %2039 = vsyncpa [#allocation6 + $0x1], 1 }
 0x728   :  { %2040 = vsyncpa [#allocation17], 1 }
 0x729   :  { %2042 = vsyncpa [#allocation17 + $0x1], 1 }

</bundles_post_ra>
